<compile_context>
chip_gen: v7x
topology: tpu7x:2x2x1
jax: 0.10.0
libtpu: 0.0.40
codegen_flags: <defaults>
</compile_context>

<pallas_src>
import math

import jax
import jax.numpy as jnp
from jax.experimental import pallas as pl
from jax.experimental.pallas import tpu as pltpu


def _round_up(x: int, m: int) -> int:
    return ((x + m - 1) // m) * m


def _interp_matrix(in_size: int, out_size: int, scale: float) -> jnp.ndarray:
    """1-D linear interpolation matrix (out_size, in_size).

    PyTorch align_corners=False semantics: half-pixel centers, negative source
    coords clamped to 0, upper index clamped to in_size-1, using the provided
    scale factor (recompute_scale_factor default).
    """
    out_idx = jnp.arange(out_size, dtype=jnp.float32)
    src = (out_idx + 0.5) / float(scale) - 0.5
    src = jnp.maximum(src, 0.0)
    i0 = jnp.floor(src).astype(jnp.int32)
    i0 = jnp.clip(i0, 0, in_size - 1)
    i1 = jnp.minimum(i0 + 1, in_size - 1)
    w1 = src - i0.astype(jnp.float32)
    w0 = 1.0 - w1
    rows = jnp.arange(out_size)
    mat = jnp.zeros((out_size, in_size), jnp.float32)
    mat = mat.at[rows, i0].add(w0)
    mat = mat.at[rows, i1].add(w1)
    return mat


def _vmem_budget_bytes() -> int:
    """Scoped-VMEM budget safe on every generation (v7x: 64 MiB physical)."""
    cap = 64 << 20
    try:  # per-generation query when running on a real TPU
        cap = int(pltpu.get_tpu_info().vmem_capacity_bytes)
    except Exception:
        pass
    return int(min(40 << 20, (cap * 3) // 5))


def _pick_block_rows(batch: int, cap_rows: int, sublane: int):
    """Rows (slices) per grid step.

    Prefers a divisor of `batch` that is a multiple of `sublane` (no host-side
    padding, aligned sublane packing) giving >=4 grid steps (DMA/compute
    overlap, both v7x TensorCores busy), then >=2, then the largest divisor.
    If no suitable divisor exists and `batch` fits one block, use a single
    full-dim block (no alignment requirement).  Padding only as a last resort.
    Returns (rows_per_block, padded_batch).
    """
    cap_rows = max(1, min(int(cap_rows), batch))
    aligned_cap = (cap_rows // sublane) * sublane
    divisors = [d for d in range(sublane, aligned_cap + 1, sublane)
                if batch % d == 0]
    if divisors:
        for min_steps in (4, 2, 1):
            cands = [d for d in divisors if batch // d >= min_steps]
            if cands:
                return max(cands), batch
    if batch <= cap_rows:
        return batch, batch                      # single full block
    tb = max(sublane, aligned_cap)               # rare ragged fallback
    return tb, _round_up(batch, tb)


def _fused_kernel(k_ref, x_ref, o_ref):
    # x_ref: (TB, HW); k_ref: (HW, HWo_pad); o_ref: (TB, HWo_pad).
    # One MXU matmul, f32 accumulation, lane-dense (last dim % 128 == 0) store.
    o_ref[...] = jnp.dot(
        x_ref[...], k_ref[...], preferred_element_type=jnp.float32
    ).astype(o_ref.dtype)


def _separable_kernel(ww_ref, wh_ref, x_ref, o_ref):
    # ww_ref: (W, Wo_pad)  resident W-interp operator (transposed, lane-padded)
    # wh_ref: (Ho, H)      resident H-interp operator
    # x_ref : (TB, H, W)   block of input slices
    # o_ref : (TB, Ho, Wo_pad)
    def body(i, carry):
        xi = x_ref[i]                                           # (H, W)
        t = jnp.dot(xi, ww_ref[...],
                    preferred_element_type=jnp.float32).astype(xi.dtype)
        o_ref[i] = jnp.dot(wh_ref[...], t,
                           preferred_element_type=jnp.float32).astype(o_ref.dtype)
        return carry
    jax.lax.fori_loop(0, x_ref.shape[0], body, 0)


def upsample3dhw(x: jnp.ndarray, scale) -> jnp.ndarray:
    """x: (N, C, D, H, W) -> (N, C, D, floor(H*scale), floor(W*scale))."""
    N, C, D, H, W = x.shape
    H_out = int(math.floor(H * scale))
    W_out = int(math.floor(W * scale))

    wh = _interp_matrix(H, H_out, scale)    # (H_out, H)
    ww = _interp_matrix(W, W_out, scale)    # (W_out, W)

    B = N * C * D
    HW = H * W
    HWo = H_out * W_out

    out_dtype = x.dtype
    compute_dtype = jnp.bfloat16 if x.dtype == jnp.bfloat16 else jnp.float32
    in_isz = jnp.dtype(compute_dtype).itemsize
    out_isz = jnp.dtype(out_dtype).itemsize
    sublane = 8 if in_isz == 4 else (16 if in_isz == 2 else 32)

    budget = _vmem_budget_bytes()
    target_block_bytes = 8 << 20     # per-step in+out bytes; amortizes ~0.35us/step
    margin = 4 << 20                 # Mosaic internal scratch / relayouts

    k_cols = _round_up(HWo, 128)     # lane-dense output width for the fused path
    k_bytes = HW * k_cols * in_isz
    use_fused = (HW <= 512) and (k_bytes <= (2 << 20))

    if use_fused:
        # ----------------- fused single-matmul path -----------------
        # K[h*W + w, o*W_out + p] = wh[o, h] * ww[p, w]; zero-pad lane dim.
        k = jnp.einsum("oh,pw->hwop", wh, ww).reshape(HW, HWo)
        if k_cols != HWo:
            k = jnp.pad(k, ((0, 0), (0, k_cols - HWo)))
        k = k.astype(compute_dtype)

        x2 = x.reshape(B, HW).astype(compute_dtype)

        row_pipe = HW * in_isz + k_cols * out_isz
        cap_rows_vmem = max(1, (budget - 2 * k_bytes - margin) // (2 * row_pipe))
        cap_rows = min(cap_rows_vmem, max(1, target_block_bytes // row_pipe))
        tb, B_pad = _pick_block_rows(B, cap_rows, sublane)
        grid = B_pad // tb
        if B_pad != B:
            # TODO(synk): rare ragged-batch case (no sublane-aligned divisor of
            # B and B too large for one block); handled via padding.
            x2 = jnp.pad(x2, ((0, B_pad - B), (0, 0)))

        vmem_need = 2 * tb * row_pipe + 2 * k_bytes + margin
        vmem_limit = int(max(vmem_need, 32 << 20))

        cost = pl.CostEstimate(
            flops=2 * B_pad * HW * k_cols,
            transcendentals=0,
            bytes_accessed=B_pad * row_pipe + k_bytes,
        )

        out2 = pl.pallas_call(
            _fused_kernel,
            out_shape=jax.ShapeDtypeStruct((B_pad, k_cols), out_dtype),
            grid_spec=pltpu.PrefetchScalarGridSpec(
                num_scalar_prefetch=0,
                grid=(grid,),
                in_specs=[
                    # constant index_map -> K stays resident, no per-step DMA
                    pl.BlockSpec((HW, k_cols), lambda b: (0, 0)),
                    pl.BlockSpec((tb, HW), lambda b: (b, 0)),
                ],
                out_specs=pl.BlockSpec((tb, k_cols), lambda b: (b, 0)),
            ),
            compiler_params=pltpu.CompilerParams(
                dimension_semantics=("parallel",),
                vmem_limit_bytes=vmem_limit,
            ),
            cost_estimate=cost,
        )(k, x2)

        if B_pad != B:
            out2 = out2[:B]
        if k_cols != HWo:
            out2 = out2[:, :HWo]
        return out2.reshape(N, C, D, H_out, W_out)

    # ----------------- separable two-matmul path -----------------
    Wo_p = _round_up(W_out, 128)
    ww_t = ww.T                                   # (W, W_out)
    if Wo_p != W_out:
        ww_t = jnp.pad(ww_t, ((0, 0), (0, Wo_p - W_out)))
    ww_t = ww_t.astype(compute_dtype)
    wh_c = wh.astype(compute_dtype)               # (H_out, H)

    row_pipe = HW * in_isz + H_out * Wo_p * out_isz
    resident = 2 * (W * Wo_p + H_out * H) * in_isz
    scratch_const = (H * Wo_p * (4 + in_isz)      # t (f32) + cast copy
                     + HW * in_isz                # loaded slice
                     + H_out * Wo_p * 4)          # second dot f32 result
    avail = budget - resident - scratch_const - margin
    if avail < 2 * row_pipe:
        # TODO(synk): spatially-tiled kernel for extreme H/W where even one
        # slice + intermediates exceeds the VMEM budget.
        return jnp.einsum("oh,ncdhw,pw->ncdop", wh, x, ww).astype(out_dtype)

    cap_rows_vmem = avail // (2 * row_pipe)
    cap_rows = min(cap_rows_vmem, max(1, target_block_bytes // row_pipe))
    tb, B_pad = _pick_block_rows(B, cap_rows, sublane)
    grid = B_pad // tb

    x3 = x.reshape(B, H, W).astype(compute_dtype)
    if B_pad != B:
        # TODO(synk): rare ragged-batch case; handled via padding.
        x3 = jnp.pad(x3, ((0, B_pad - B), (0, 0), (0, 0)))

    vmem_need = 2 * tb * row_pipe + resident + scratch_const + margin
    vmem_limit = int(max(vmem_need, 32 << 20))

    cost = pl.CostEstimate(
        flops=2 * B_pad * Wo_p * (HW + H_out * H),
        transcendentals=0,
        bytes_accessed=B_pad * row_pipe + resident // 2,
    )

    out3 = pl.pallas_call(
        _separable_kernel,
        out_shape=jax.ShapeDtypeStruct((B_pad, H_out, Wo_p), out_dtype),
        grid_spec=pltpu.PrefetchScalarGridSpec(
            num_scalar_prefetch=0,
            grid=(grid,),
            in_specs=[
                pl.BlockSpec((W, Wo_p), lambda b: (0, 0)),     # resident
                pl.BlockSpec((H_out, H), lambda b: (0, 0)),    # resident
                pl.BlockSpec((tb, H, W), lambda b: (b, 0, 0)),
            ],
            out_specs=pl.BlockSpec((tb, H_out, Wo_p), lambda b: (b, 0, 0)),
        ),
        compiler_params=pltpu.CompilerParams(
            dimension_semantics=("parallel",),
            vmem_limit_bytes=vmem_limit,
        ),
        cost_estimate=cost,
    )(ww_t, wh_c, x3)

    if B_pad != B:
        out3 = out3[:B]
    if Wo_p != W_out:
        out3 = out3[:, :, :W_out]
    return out3.reshape(N, C, D, H_out, W_out)


if __name__ == "__main__":
    root = jax.random.PRNGKey(0)
    k1, k2 = jax.random.split(root)
    scale = 2
    H = W = 16

    # float32 input -> fused single-matmul path
    N, C, D = 2, 4, 3
    x = jax.random.normal(k1, (N, C, D, H, W), dtype=jnp.float32)
    out = jax.block_until_ready(upsample3dhw(x, scale))

    wh = _interp_matrix(H, H * scale, scale)
    ww = _interp_matrix(W, W * scale, scale)
    ref = jnp.einsum("oh,ncdhw,pw->ncdop", wh, x, ww)
    assert out.shape == (N, C, D, H * scale, W * scale), out.shape
    # MXU default precision runs f32 matmuls as bf16 passes and the reference
    # einsum contracts in a different order -> compare with a loose tolerance.
    err = float(jnp.max(jnp.abs(out - ref)))
    assert err < 5e-2, err

    # bfloat16 fast path (bf16 operands to the MXU, f32 accumulation)
    Nb, Cb, Db = 2, 4, 4
    xb = jax.random.normal(k2, (Nb, Cb, Db, H, W)).astype(jnp.bfloat16)
    outb = jax.block_until_ready(upsample3dhw(xb, scale))
    refb = jnp.einsum("oh,ncdhw,pw->ncdop", wh, xb.astype(jnp.float32), ww)
    assert outb.shape == (Nb, Cb, Db, H * scale, W * scale), outb.shape
    errb = float(jnp.max(jnp.abs(outb.astype(jnp.float32) - refb)))
    assert errb < 1e-1, errb

    print("KERNEL_OK")
</pallas_src>

<mosaic_0001>
module attributes {stable_mosaic.version = 11 : i64} {
  func.func @_fused_kernel(%arg0: i32, %arg1: memref<256x1024xf32, #tpu.memory_space<vmem>>, %arg2: memref<8x256xf32, #tpu.memory_space<vmem>>, %arg3: memref<8x1024xf32, #tpu.memory_space<vmem>>) attributes {dimension_semantics = [#tpu.dimension_semantics<parallel>], iteration_bounds = array<i64: 3>, scalar_prefetch = 0 : i64, scratch_operands = 0 : i64, tpu.core_type = #tpu.core_type<tc>, window_params = [{pipeline_mode = #tpu.pipeline_mode<synchronous>, transform_indices = @transform_0, window_bounds = array<i64: 256, 1024>}, {transform_indices = @transform_1, window_bounds = array<i64: 8, 256>}, {transform_indices = @transform_2, window_bounds = array<i64: 8, 1024>}]} {
    %c0 = arith.constant 0 : index
    %c0_0 = arith.constant 0 : index
    %0 = vector.load %arg2[%c0, %c0_0] : memref<8x256xf32, #tpu.memory_space<vmem>>, vector<8x256xf32>
    %c0_1 = arith.constant 0 : index
    %c0_2 = arith.constant 0 : index
    %1 = vector.load %arg1[%c0_1, %c0_2] : memref<256x1024xf32, #tpu.memory_space<vmem>>, vector<256x1024xf32>
    %cst = arith.constant dense<0.000000e+00> : vector<8x1024xf32>
    %2 = tpu.matmul %0, %1, %cst {dimension_numbers = #tpu.dot_dimension_numbers<[1], [0], [0], [1], [0, 0, 1, 1], [], []>} : vector<8x256xf32>, vector<256x1024xf32>, vector<8x1024xf32> -> vector<8x1024xf32>
    %c0_3 = arith.constant 0 : index
    %c0_4 = arith.constant 0 : index
    %3 = vector.load %arg3[%c0_3, %c0_4] : memref<8x1024xf32, #tpu.memory_space<vmem>>, vector<8x1024xf32>
    tpu.vector_store %arg3[%c0_3, %c0_4], %2 {strides = array<i32>} : memref<8x1024xf32, #tpu.memory_space<vmem>>, vector<8x1024xf32>,
    return
  }
  func.func @transform_0(%arg0: i32) -> (i32, i32) {
    %c0_i32 = arith.constant 0 : i32
    %c0_i32_0 = arith.constant 0 : i32
    %c0_i32_1 = arith.constant 0 : i32
    return %c0_i32, %c0_i32_0 : i32, i32
  }
  func.func @transform_1(%arg0: i32) -> (i32, i32) {
    %c0_i32 = arith.constant 0 : i32
    %c0_i32_0 = arith.constant 0 : i32
    return %arg0, %c0_i32 : i32, i32
  }
  func.func @transform_2(%arg0: i32) -> (i32, i32) {
    %c0_i32 = arith.constant 0 : i32
    %c0_i32_0 = arith.constant 0 : i32
    return %arg0, %c0_i32 : i32, i32
  }
}

</mosaic_0001>

<bundles_post_ra>
// kernel: tpu_custom_call.1
= control target key start
LH: loop header
LB: loop body
LE: loop exit
PB: predicated region body
PF: predicated region fallthrough
CT: control target
= control target key end

     0   :  { %7 = vsyncpa [#allocation3], 0  ;;  %s1509_s0 = inlined_call_operand.hbm [shape: f32[256,1024], index: 0, kind: input, shape index: {}]   ;;  %s1510_s1 = inlined_call_operand.hbm [shape: f32[24,256], index: 1, kind: input, shape index: {}]   ;;  %s1511_s2 = inlined_call_operand.hbm [shape: f32[24,1024], index: 2, kind: output, shape index: {}]  }
   0x1   :  { %8 = vsyncpa [#allocation6], 0 }
   0x2   :  { %10 = vsyncpa [#allocation6 + $0x1], 0 }
   0x3   :  { %11 = vsyncpa [#allocation4], 0 }
   0x4   :  { %13 = vsyncpa [#allocation4 + $0x1], 0  ;;  %s1305_s9 = smov 0   ;;  %s1307_s10 = smov 0  }
   0x5   :  { %s1309_s11 = smov 0   ;;  %s1311_s12 = smov 0  }
   0x6 LB: > { %s1326_s13 = sadd.s32 4294967295, %s1283_s12   ;;  %s822_s14 = sadd.s32 4294967294, %s1283_s12   ;;  %s1283_s12 = sphi %s1311_s12, %s1530_s12   ;;  %s1279_s11 = sphi %s1309_s11, %s1529_s11   ;;  %s1275_s10 = sphi %s1307_s10, %s1528_s10   ;;  %s1271_s9 = sphi %s1305_s9, %s1527_s9  }
   0x7   : > { %p60_p0 = scmp.ne.s32.totalorder %s1275_s10, %s1271_s9  ;;  %p1512_p1 = scmp.eq.s32.totalorder %s1326_s13, 0 }
   0x8   : > { %p90_p3 = scmp.eq.s32.totalorder %s822_s14, 2  ;;  %p823_p5 = scmp.ge.s32.totalorder %s1283_s12, 1 }
   0x9   : > { %p1335_p4 = por %p1512_p1, %p60_p0  ;;  %p97_p7 = scmp.lt.s32.totalorder %s1283_s12, 4 }
   0xa   : > { %p1340_p6 = por %p90_p3, %p60_p0  ;;  %s1285_s18 = smov [#allocation2]  }
   0xb   : > { %s1515_s15 = scalar_select %p1335_p4, 1, 0 }
   0xc   : > { %s1516_s16 = scalar_select %p1340_p6, 1, 0 }
   0xd   : > { %p1345_p8 = pnand %p823_p5, %p97_p7  ;;  %s109_s19 = sshll.u32 %s1285_s18, 4  ;;  %s110_s19 = int_to_ptr.vmem [resolvable:$true] %s109_s19 }
   0xe   : > { %s1358_s21 = sadd.s32 1, %s1283_s12   ;;  %s47_s22 = sadd.s32 1, %s1279_s11 }
   0xf   : > { %s1517_s17 = scalar_select %p1345_p8, 1, 0 }
  0x10   : > { %p1104_p9 = pneg %p1345_p8  ;;  %s44_s23 = ssub.s32 %s1283_s12, %s1358_s21 }
  0x11   : > { %s1155_s26 = scalar_lea.hbm %s1509_s0, 32768 }
  0x12   : > { %p1353_p10 = pnand %p1104_p9, %p1512_p1  ;;  %p1156_p11 = scmp.ne.s32.totalorder %s1509_s0, %s1155_s26 }
  0x13   : > { %p1162_p3 = scmp.lt.u32.totalorder %s1155_s26, %s1509_s0 }
  0x14   : > { %p1157_p12 = pneg %p1353_p10 }
  0x16   : > { %p1158_p13 = pnand %p1157_p12, %p1156_p11 }
  0x18   : > { %p1159_p0 = pneg %p1158_p13 }
  0x1a   : > { %p1164_p5 = pnand %p1162_p3, %p1159_p0 }
  0x1c   : > { %1167 = shalt.err (!%p1164_p5)
}
  0x1d   : > { %s1168_s3 = scalar_lea.vmem %s110_s19, 32768  ;;  %p1176_p2 = scmp.lt.s32.totalorder %s110_s19, %s110_s19 }
  0x1e   : > { %p1169_p7 = scmp.ne.s32.totalorder %s110_s19, %s1168_s3  ;;  %p1177_p6 = scmp.lt.s32.totalorder %s1168_s3, %s1168_s3 }
  0x20   : > { %p1171_p9 = pnand %p1169_p7, %p1157_p12  ;;  %p1178_p4 = por %p1177_p6, %p1176_p2 }
  0x22   : > { %p1172_p1 = pneg %p1171_p9 }
  0x24   : > { %p1179_p8 = pnand %p1178_p4, %p1172_p1 }
  0x26   : > { %1182 = shalt.err (!%p1179_p8)
}
  0x27   : > { %s1286_s4 = smov 1024   ;;  %s1287_s5 = smov 64  }
  0x28   : > { %1107 = dma.hbm_to_vmem [thread:$0]  (!%p1353_p10), %s1509_s0, 32768, %s110_s19, [#allocation3], %s1286_s4, %s1286_s4, %s1287_s5  }
  0x29   : > { %p45_p11 = scmp.eq.s32.totalorder %s44_s23, 0  ;;  %p54_p2 = scmp.ne.s32.totalorder %s1279_s11, %s1275_s10 }
  0x2a   : > { %p55_p1 = scmp.eq.s32.totalorder %s1283_s12, 0  ;;  %p1117_p4 = scmp.lt.s32.totalorder %s1283_s12, 3 }
  0x2b   : > { %s1384_s8 = scalar_select %p45_p11, %s1279_s11, %s47_s22  }
  0x2c   : > { %p56_p6 = por %p55_p1, %p54_p2  ;;  %p1519_p8 = scmp.eq.s32.totalorder %s1326_s13, 2 }
  0x2d   : > { %s123_s18 = sand.u32 1, %s1279_s11   ;;  %s838_s24 = sshll.u32 %s1283_s12, 8 }
  0x2e   : > { %p1388_p12 = por %p1519_p8, %p54_p2  ;;  %s826_s25 = sshll.u32 %s123_s18, 4 }
  0x2f   : > { %s1397_s27 = scalar_lea.hbm %s1510_s1, %s838_s24  ;;  %s127_s19 = scalar_lea.vmem [#allocation5], %s826_s25 }
  0x30   : > { %s135_s22 = sshll.u32 %s127_s19, 4  ;;  %p1399_p10 = pnand %p1117_p4, %p56_p6  ;;  %s1403_s22 = int_to_ptr.vmem [resolvable:$true] %s135_s22 }
  0x31   : > { %s124_s28 = scalar_lea.sflag [#allocation6], %s123_s18  ;;  %s1183_s29 = scalar_lea.hbm %s1397_s27, 256 }
  0x32   : > { %p1184_p13 = scmp.ne.s32.totalorder %s1397_s27, %s1183_s29  ;;  %p1185_p0 = pneg %p1399_p10 }
  0x33   : > { %s1188_s4 = scalar_lea.hbm %s1510_s1, 768  ;;  %p1189_p7 = scmp.lt.u32.totalorder %s1397_s27, %s1510_s1 }
  0x34   : > { %p1186_p3 = pnand %p1185_p0, %p1184_p13  ;;  %p1190_p9 = scmp.lt.u32.totalorder %s1188_s4, %s1183_s29 }
  0x35   : > { %p1192_p2 = scmp.lt.u32.totalorder %s1183_s29, %s1397_s27 }
  0x36   : > { %p1187_p5 = pneg %p1186_p3  ;;  %p1191_p11 = por %p1190_p9, %p1189_p7 }
  0x38   : > { %p1193_p1 = por %p1192_p2, %p1191_p11 }
  0x3a   : > { %p1194_p4 = pnand %p1193_p1, %p1187_p5 }
  0x3c   : > { %1197 = shalt.err (!%p1194_p4)
}
  0x3d   : > { %s1198_s7 = scalar_lea.vmem %s1403_s22, 256  ;;  %s1288_s18 = smov [#allocation5]  }
  0x3e   : > { %p1199_p6 = scmp.ne.s32.totalorder %s1403_s22, %s1198_s7  ;;  %s1203_s24 = sshll.u32 %s1288_s18, 4  ;;  %s1204_s24 = int_to_ptr.vmem [resolvable:$false] %s1203_s24 }
  0x3f   : > { %s1205_s25 = scalar_lea.vmem %s1204_s24, 512  ;;  %p1206_p3 = scmp.lt.s32.totalorder %s1403_s22, %s1204_s24 }
  0x40   : > { %p1201_p8 = pnand %p1199_p6, %p1185_p0  ;;  %p1207_p7 = scmp.lt.s32.totalorder %s1205_s25, %s1198_s7 }
  0x42   : > { %p1202_p13 = pneg %p1201_p8  ;;  %p1208_p9 = por %p1207_p7, %p1206_p3 }
  0x44   : > { %p1209_p11 = pnand %p1208_p9, %p1202_p13 }
  0x46   : > { %1212 = shalt.err (!%p1209_p11)
}
  0x47   : > { %1111 = dma.hbm_to_vmem [thread:$0]  (!%p1399_p10), %s1397_s27, 256, %s1403_s22, %s124_s28  }
  0x48   : > { %p1522_p5 = scmp.ne.s32.totalorder %s1517_s17, 0 }
  0x49   : > { %p1523_p0 = scmp.eq.s32.totalorder (!%p1522_p5), %s1326_s13, 0 }
  0x4a   : > { %144 = sbr.rel (%p1522_p5) target bundleno = 446 (0x1be), region = 28 }
  0x51   : > { %1258 = dma.done.wait (%p1523_p0), [#allocation3], 32768   ;;  %p1524_p2 = pmov %p1523_p0 }
  0x52   : > { %s1437_s20 = sand.u32 1, %s1275_s10   ;;  %p1525_p10 = scmp.ne.s32.totalorder %s1515_s15, 0 }
  0x53   : > { %1260 = vsyncadd (%p1524_p2), [#allocation3], 4294934528  ;;  %s831_s26 = sshll.u32 %s1437_s20, 4  ;;  %s151_s19 = scalar_lea.sflag [#allocation6], %s1437_s20 }
  0x54   : > { %s1441_s23 = scalar_lea.vmem [#allocation5], %s831_s26 }
  0x55   : > { %1262 = dma.done.wait (%p1525_p10), %s151_s19, 256  }
  0x56   : > { %1264 = vsyncadd (%p1525_p10), %s151_s19, 4294967040  ;;  %v178_v0 = vld [vmem:[#allocation2 + $0x8] sm:$0xff]  ;;  %v180_v2 = vld [vmem:[#allocation2 + $0x18] sm:$0xff]  ;;  %s832_s15 = sshll.u32 %s1437_s20, 6  ;;  %s839_s27 = sshll.u32 %s1326_s13, 10 }
  0x57   : > { %v186_v1 = vld [vmem:[#allocation2 + $0x48] sm:$0xff]  ;;  %v188_v4 = vld [vmem:[#allocation2 + $0x58] sm:$0xff]  ;;  %v177_v5 = vld [vmem:[#allocation2] sm:$0xff]  ;;  %s174_s17 = scalar_lea.vmem [#allocation7], %s832_s15  ;;  %s1466_s30 = scalar_lea.hbm %s1511_s2, %s839_s27 }
  0x58   : > { %v840_v3 = vpack.c.bf16 %v186_v1, %v178_v0  ;;  %v185_v6 = vld [vmem:[#allocation2 + $0x40] sm:$0xff]  ;;  %v904_v7 = vpack.c.bf16 %v188_v4, %v180_v2  ;;  %v179_v9 = vld [vmem:[#allocation2 + $0x10] sm:$0xff]  ;;  %v194_v11 = vld [vmem:[#allocation2 + $0x88] sm:$0xff]  ;;  %s740_s22 = sshll.u32 %s174_s17, 4  ;;  %s726_s13 = scalar_lea.sflag [#allocation4], %s1437_s20  ;;  %s1468_s22 = int_to_ptr.vmem [resolvable:$true] %s740_s22 }
  0x59   : > { %v842_v8 = vpack.c.bf16 %v185_v6, %v177_v5  ;;  %v187_v10 = vld [vmem:[#allocation2 + $0x50] sm:$0xff]  ;;  %v202_v13 = vld [vmem:[#allocation2 + $0xc8] sm:$0xff]  ;;  %v196_v14 = vld [vmem:[#allocation2 + $0x98] sm:$0xff]  ;;  %s1213_s3 = scalar_lea.vmem %s1468_s22, 1024  ;;  %s1289_s4 = smov [#allocation7]  }
  0x5a   : > { %841 = vmatprep.subr.bf16.mxu0 %v840_v3  ;;  %v906_v12 = vpack.c.bf16 %v187_v10, %v179_v9  ;;  %v204_v15 = vld [vmem:[#allocation2 + $0xd8] sm:$0xff]  ;;  %905 = vmatprep.subr.bf16.mxu1 %v904_v7  ;;  %v844_v16 = vpack.c.bf16 %v202_v13, %v194_v11  ;;  %v193_v18 = vld [vmem:[#allocation2 + $0x80] sm:$0xff]  ;;  %v195_v20 = vld [vmem:[#allocation2 + $0x90] sm:$0xff]  ;;  %p1214_p1 = scmp.ne.s32.totalorder %s1468_s22, %s1213_s3  ;;  %s1217_s5 = sshll.u32 %s1289_s4, 4  ;;  %s1218_s5 = int_to_ptr.vmem [resolvable:$false] %s1217_s5 }
  0x5b   : > { %843 = vmatpush1.bf16.msra.mxu0 %v842_v8  ;;  %v908_v17 = vpack.c.bf16 %v204_v15, %v196_v14  ;;  %v201_v19 = vld [vmem:[#allocation2 + $0xc0] sm:$0xff]  ;;  %v203_v22 = vld [vmem:[#allocation2 + $0xd0] sm:$0xff]  ;;  %v210_v23 = vld [vmem:[#allocation2 + $0x108] sm:$0xff]  ;;  %s1219_s6 = scalar_lea.vmem %s1218_s5, 2048  ;;  %p1220_p8 = scmp.lt.s32.totalorder %s1468_s22, %s1218_s5 }
  0x5c   : > { %907 = vmatpush1.bf16.msra.mxu1 %v906_v12  ;;  %v846_v21 = vpack.c.bf16 %v201_v19, %v193_v18  ;;  %v218_v24 = vld [vmem:[#allocation2 + $0x148] sm:$0xff]  ;;  %845 = vmatprep.subr.bf16.mxu0 %v844_v16  ;;  %v910_v25 = vpack.c.bf16 %v203_v22, %v195_v20  ;;  %v212_v27 = vld [vmem:[#allocation2 + $0x118] sm:$0xff]  ;;  %v209_v29 = vld [vmem:[#allocation2 + $0x100] sm:$0xff]  ;;  %p1215_p4 = pnand %p1214_p1, %p1388_p12  ;;  %p1221_p13 = scmp.lt.s32.totalorder %s1219_s6, %s1213_s3 }
  0x5d   : > { %909 = vmatprep.subr.bf16.mxu1 %v908_v17  ;;  %v848_v26 = vpack.c.bf16 %v218_v24, %v210_v23  ;;  %v220_v28 = vld [vmem:[#allocation2 + $0x158] sm:$0xff]  ;;  %v217_v31 = vld [vmem:[#allocation2 + $0x140] sm:$0xff]  ;;  %v211_v32 = vld [vmem:[#allocation2 + $0x110] sm:$0xff] }
  0x5e   : > { %v912_v30 = vpack.c.bf16 %v220_v28, %v212_v27  ;;  %v219_v33 = vld [vmem:[#allocation2 + $0x150] sm:$0xff]  ;;  %v850_v34 = vpack.c.bf16 %v217_v31, %v209_v29  ;;  %v226_v35 = vld [vmem:[#allocation2 + $0x188] sm:$0xff]  ;;  %v228_v37 = vld [vmem:[#allocation2 + $0x198] sm:$0xff]  ;;  %p1216_p6 = pneg %p1215_p4  ;;  %p1222_p3 = por %p1221_p13, %p1220_p8 }
  0x5f   : > { %847 = vmatpush1.bf16.msra.mxu0 %v846_v21  ;;  %v234_v36 = vld [vmem:[#allocation2 + $0x1c8] sm:$0xff]  ;;  %v914_v38 = vpack.c.bf16 %v219_v33, %v211_v32  ;;  %v236_v40 = vld [vmem:[#allocation2 + $0x1d8] sm:$0xff]  ;;  %v225_v41 = vld [vmem:[#allocation2 + $0x180] sm:$0xff] }
  0x60   : > { %911 = vmatpush1.bf16.msra.mxu1 %v910_v25  ;;  %849 = vmatprep.subr.bf16.mxu0 %v848_v26  ;;  %v852_v39 = vpack.c.bf16 %v234_v36, %v226_v35  ;;  %v233_v42 = vld [vmem:[#allocation2 + $0x1c0] sm:$0xff]  ;;  %v916_v43 = vpack.c.bf16 %v236_v40, %v228_v37  ;;  %v227_v44 = vld [vmem:[#allocation2 + $0x190] sm:$0xff]  ;;  %v242_v46 = vld [vmem:[#allocation2 + $0x208] sm:$0xff]  ;;  %p1223_p7 = pnand %p1222_p3, %p1216_p6 }
  0x61   : > { %913 = vmatprep.subr.bf16.mxu1 %v912_v30  ;;  %v235_v45 = vld [vmem:[#allocation2 + $0x1d0] sm:$0xff]  ;;  %v250_v47 = vld [vmem:[#allocation2 + $0x248] sm:$0xff]  ;;  %v244_v48 = vld [vmem:[#allocation2 + $0x218] sm:$0xff]  ;;  %v854_v50 = vpack.c.bf16 %v233_v42, %v225_v41 }
  0x62   : > { %v252_v49 = vld [vmem:[#allocation2 + $0x258] sm:$0xff]  ;;  %v918_v51 = vpack.c.bf16 %v235_v45, %v227_v44  ;;  %v856_v52 = vpack.c.bf16 %v250_v47, %v242_v46  ;;  %v241_v53 = vld [vmem:[#allocation2 + $0x200] sm:$0xff]  ;;  %v243_v55 = vld [vmem:[#allocation2 + $0x210] sm:$0xff] }
  0x63   : > { %851 = vmatpush1.bf16.msra.mxu0 %v850_v34  ;;  %v249_v54 = vld [vmem:[#allocation2 + $0x240] sm:$0xff]  ;;  %v920_v56 = vpack.c.bf16 %v252_v49, %v244_v48  ;;  %v251_v57 = vld [vmem:[#allocation2 + $0x250] sm:$0xff]  ;;  %v258_v58 = vld [vmem:[#allocation2 + $0x288] sm:$0xff] }
  0x64   : > { %915 = vmatpush1.bf16.msra.mxu1 %v914_v38  ;;  %853 = vmatprep.subr.bf16.mxu0 %v852_v39  ;;  %v266_v59 = vld [vmem:[#allocation2 + $0x2c8] sm:$0xff]  ;;  %v260_v60 = vld [vmem:[#allocation2 + $0x298] sm:$0xff]  ;;  %v858_v62 = vpack.c.bf16 %v249_v54, %v241_v53  ;;  %v922_v63 = vpack.c.bf16 %v251_v57, %v243_v55  ;;  %v257_v1 = vld [vmem:[#allocation2 + $0x280] sm:$0xff] }
  0x65   : > { %917 = vmatprep.subr.bf16.mxu1 %v916_v43  ;;  %v268_v61 = vld [vmem:[#allocation2 + $0x2d8] sm:$0xff]  ;;  %v860_v0 = vpack.c.bf16 %v266_v59, %v258_v58  ;;  %v265_v2 = vld [vmem:[#allocation2 + $0x2c0] sm:$0xff]  ;;  %v259_v3 = vld [vmem:[#allocation2 + $0x290] sm:$0xff] }
  0x66   : > { %v924_v4 = vpack.c.bf16 %v268_v61, %v260_v60  ;;  %v267_v5 = vld [vmem:[#allocation2 + $0x2d0] sm:$0xff]  ;;  %v274_v6 = vld [vmem:[#allocation2 + $0x308] sm:$0xff]  ;;  %v276_v8 = vld [vmem:[#allocation2 + $0x318] sm:$0xff]  ;;  %v862_v10 = vpack.c.bf16 %v265_v2, %v257_v1 }
  0x67   : > { %855 = vmatpush1.bf16.msra.mxu0 %v854_v50  ;;  %v282_v7 = vld [vmem:[#allocation2 + $0x348] sm:$0xff]  ;;  %v284_v9 = vld [vmem:[#allocation2 + $0x358] sm:$0xff]  ;;  %v926_v11 = vpack.c.bf16 %v267_v5, %v259_v3  ;;  %v273_v13 = vld [vmem:[#allocation2 + $0x300] sm:$0xff] }
  0x68   : > { %919 = vmatpush1.bf16.msra.mxu1 %v918_v51  ;;  %857 = vmatprep.subr.bf16.mxu0 %v856_v52  ;;  %v864_v12 = vpack.c.bf16 %v282_v7, %v274_v6  ;;  %v281_v14 = vld [vmem:[#allocation2 + $0x340] sm:$0xff]  ;;  %v275_v15 = vld [vmem:[#allocation2 + $0x310] sm:$0xff]  ;;  %v928_v16 = vpack.c.bf16 %v284_v9, %v276_v8  ;;  %v290_v18 = vld [vmem:[#allocation2 + $0x388] sm:$0xff] }
  0x69   : > { %921 = vmatprep.subr.bf16.mxu1 %v920_v56  ;;  %v283_v17 = vld [vmem:[#allocation2 + $0x350] sm:$0xff]  ;;  %v298_v19 = vld [vmem:[#allocation2 + $0x3c8] sm:$0xff]  ;;  %v292_v20 = vld [vmem:[#allocation2 + $0x398] sm:$0xff]  ;;  %v866_v22 = vpack.c.bf16 %v281_v14, %v273_v13 }
  0x6a   : > { %v300_v21 = vld [vmem:[#allocation2 + $0x3d8] sm:$0xff]  ;;  %v930_v23 = vpack.c.bf16 %v283_v17, %v275_v15  ;;  %v868_v24 = vpack.c.bf16 %v298_v19, %v290_v18  ;;  %v289_v25 = vld [vmem:[#allocation2 + $0x380] sm:$0xff]  ;;  %v291_v27 = vld [vmem:[#allocation2 + $0x390] sm:$0xff] }
  0x6b   : > { %859 = vmatpush1.bf16.msra.mxu0 %v858_v62  ;;  %v297_v26 = vld [vmem:[#allocation2 + $0x3c0] sm:$0xff]  ;;  %v932_v28 = vpack.c.bf16 %v300_v21, %v292_v20  ;;  %v299_v29 = vld [vmem:[#allocation2 + $0x3d0] sm:$0xff]  ;;  %v306_v30 = vld [vmem:[#allocation2 + $0x408] sm:$0xff] }
  0x6c   : > { %923 = vmatpush1.bf16.msra.mxu1 %v922_v63  ;;  %861 = vmatprep.subr.bf16.mxu0 %v860_v0  ;;  %v314_v31 = vld [vmem:[#allocation2 + $0x448] sm:$0xff]  ;;  %v308_v32 = vld [vmem:[#allocation2 + $0x418] sm:$0xff]  ;;  %v870_v34 = vpack.c.bf16 %v297_v26, %v289_v25  ;;  %v934_v35 = vpack.c.bf16 %v299_v29, %v291_v27  ;;  %v305_v37 = vld [vmem:[#allocation2 + $0x400] sm:$0xff] }
  0x6d   : > { %925 = vmatprep.subr.bf16.mxu1 %v924_v4  ;;  %v316_v33 = vld [vmem:[#allocation2 + $0x458] sm:$0xff]  ;;  %v872_v36 = vpack.c.bf16 %v314_v31, %v306_v30  ;;  %v313_v38 = vld [vmem:[#allocation2 + $0x440] sm:$0xff]  ;;  %v307_v39 = vld [vmem:[#allocation2 + $0x410] sm:$0xff] }
  0x6e   : > { %v936_v40 = vpack.c.bf16 %v316_v33, %v308_v32  ;;  %v315_v41 = vld [vmem:[#allocation2 + $0x450] sm:$0xff]  ;;  %v322_v42 = vld [vmem:[#allocation2 + $0x488] sm:$0xff]  ;;  %v324_v44 = vld [vmem:[#allocation2 + $0x498] sm:$0xff]  ;;  %v874_v46 = vpack.c.bf16 %v313_v38, %v305_v37 }
  0x6f   : > { %863 = vmatpush1.bf16.msra.mxu0 %v862_v10  ;;  %v330_v43 = vld [vmem:[#allocation2 + $0x4c8] sm:$0xff]  ;;  %v332_v45 = vld [vmem:[#allocation2 + $0x4d8] sm:$0xff]  ;;  %v938_v47 = vpack.c.bf16 %v315_v41, %v307_v39  ;;  %v321_v49 = vld [vmem:[#allocation2 + $0x480] sm:$0xff] }
  0x70   : > { %927 = vmatpush1.bf16.msra.mxu1 %v926_v11  ;;  %865 = vmatprep.subr.bf16.mxu0 %v864_v12  ;;  %v876_v48 = vpack.c.bf16 %v330_v43, %v322_v42  ;;  %v329_v50 = vld [vmem:[#allocation2 + $0x4c0] sm:$0xff]  ;;  %v323_v51 = vld [vmem:[#allocation2 + $0x490] sm:$0xff]  ;;  %v940_v52 = vpack.c.bf16 %v332_v45, %v324_v44  ;;  %v338_v54 = vld [vmem:[#allocation2 + $0x508] sm:$0xff] }
  0x71   : > { %929 = vmatprep.subr.bf16.mxu1 %v928_v16  ;;  %v331_v53 = vld [vmem:[#allocation2 + $0x4d0] sm:$0xff]  ;;  %v346_v55 = vld [vmem:[#allocation2 + $0x548] sm:$0xff]  ;;  %v340_v56 = vld [vmem:[#allocation2 + $0x518] sm:$0xff]  ;;  %v878_v58 = vpack.c.bf16 %v329_v50, %v321_v49 }
  0x72   : > { %v348_v57 = vld [vmem:[#allocation2 + $0x558] sm:$0xff]  ;;  %v942_v59 = vpack.c.bf16 %v331_v53, %v323_v51  ;;  %v880_v60 = vpack.c.bf16 %v346_v55, %v338_v54  ;;  %v337_v61 = vld [vmem:[#allocation2 + $0x500] sm:$0xff]  ;;  %v339_v63 = vld [vmem:[#allocation2 + $0x510] sm:$0xff] }
  0x73   : > { %867 = vmatpush1.bf16.msra.mxu0 %v866_v22  ;;  %v345_v62 = vld [vmem:[#allocation2 + $0x540] sm:$0xff]  ;;  %v944_v0 = vpack.c.bf16 %v348_v57, %v340_v56  ;;  %v347_v1 = vld [vmem:[#allocation2 + $0x550] sm:$0xff]  ;;  %v354_v2 = vld [vmem:[#allocation2 + $0x588] sm:$0xff] }
  0x74   : > { %931 = vmatpush1.bf16.msra.mxu1 %v930_v23  ;;  %869 = vmatprep.subr.bf16.mxu0 %v868_v24  ;;  %v362_v3 = vld [vmem:[#allocation2 + $0x5c8] sm:$0xff]  ;;  %v356_v4 = vld [vmem:[#allocation2 + $0x598] sm:$0xff]  ;;  %v882_v6 = vpack.c.bf16 %v345_v62, %v337_v61  ;;  %v353_v7 = vld [vmem:[#allocation2 + $0x580] sm:$0xff]  ;;  %v946_v8 = vpack.c.bf16 %v347_v1, %v339_v63 }
  0x75   : > { %933 = vmatprep.subr.bf16.mxu1 %v932_v28  ;;  %v364_v5 = vld [vmem:[#allocation2 + $0x5d8] sm:$0xff]  ;;  %v884_v9 = vpack.c.bf16 %v362_v3, %v354_v2  ;;  %v361_v10 = vld [vmem:[#allocation2 + $0x5c0] sm:$0xff]  ;;  %v355_v11 = vld [vmem:[#allocation2 + $0x590] sm:$0xff] }
  0x76   : > { %v363_v12 = vld [vmem:[#allocation2 + $0x5d0] sm:$0xff]  ;;  %v948_v13 = vpack.c.bf16 %v364_v5, %v356_v4  ;;  %v370_v14 = vld [vmem:[#allocation2 + $0x608] sm:$0xff]  ;;  %v372_v17 = vld [vmem:[#allocation2 + $0x618] sm:$0xff]  ;;  %v886_v19 = vpack.c.bf16 %v361_v10, %v353_v7 }
  0x77   : > { %871 = vmatpush1.bf16.msra.mxu0 %v870_v34  ;;  %v378_v15 = vld [vmem:[#allocation2 + $0x648] sm:$0xff]  ;;  %v380_v18 = vld [vmem:[#allocation2 + $0x658] sm:$0xff]  ;;  %v950_v20 = vpack.c.bf16 %v363_v12, %v355_v11  ;;  %v369_v22 = vld [vmem:[#allocation2 + $0x600] sm:$0xff] }
  0x78   : > { %935 = vmatpush1.bf16.msra.mxu1 %v934_v35  ;;  %873 = vmatprep.subr.bf16.mxu0 %v872_v36  ;;  %v1448_v16 = vld [vmem:[%s1441_s23 + $0x8] sm:$0xff]  ;;  %v888_v21 = vpack.c.bf16 %v378_v15, %v370_v14  ;;  %v377_v23 = vld [vmem:[#allocation2 + $0x640] sm:$0xff]  ;;  %v371_v24 = vld [vmem:[#allocation2 + $0x610] sm:$0xff]  ;;  %v952_v25 = vpack.c.bf16 %v380_v18, %v372_v17 }
  0x79   : > { %937 = vmatprep.subr.bf16.mxu1 %v936_v40  ;;  %497 = vmatprep.mubr.f32.mxu0 %v1448_v16  ;;  %v379_v26 = vld [vmem:[#allocation2 + $0x650] sm:$0xff]  ;;  %v386_v27 = vld [vmem:[#allocation2 + $0x688] sm:$0xff]  ;;  %v388_v29 = vld [vmem:[#allocation2 + $0x698] sm:$0xff]  ;;  %v890_v31 = vpack.c.bf16 %v377_v23, %v369_v22 }
  0x7a   : > { %568 = vmatprep.mubr.f32.mxu1 %v1448_v16  ;;  %v394_v28 = vld [vmem:[#allocation2 + $0x6c8] sm:$0xff]  ;;  %v396_v30 = vld [vmem:[#allocation2 + $0x6d8] sm:$0xff]  ;;  %v954_v32 = vpack.c.bf16 %v379_v26, %v371_v24  ;;  %v385_v34 = vld [vmem:[#allocation2 + $0x680] sm:$0xff] }
  0x7b   : > { %875 = vmatpush1.bf16.msra.mxu0 %v874_v46  ;;  %v892_v33 = vpack.c.bf16 %v394_v28, %v386_v27  ;;  %v393_v35 = vld [vmem:[#allocation2 + $0x6c0] sm:$0xff]  ;;  %v387_v36 = vld [vmem:[#allocation2 + $0x690] sm:$0xff]  ;;  %v956_v37 = vpack.c.bf16 %v396_v30, %v388_v29  ;;  %v402_v39 = vld [vmem:[#allocation2 + $0x708] sm:$0xff] }
  0x7c   : > { %939 = vmatpush1.bf16.msra.mxu1 %v938_v47  ;;  %877 = vmatprep.subr.bf16.mxu0 %v876_v48  ;;  %v395_v38 = vld [vmem:[#allocation2 + $0x6d0] sm:$0xff]  ;;  %v410_v40 = vld [vmem:[#allocation2 + $0x748] sm:$0xff]  ;;  %v404_v41 = vld [vmem:[#allocation2 + $0x718] sm:$0xff]  ;;  %v894_v43 = vpack.c.bf16 %v393_v35, %v385_v34 }
  0x7d   : > { %941 = vmatprep.subr.bf16.mxu1 %v940_v52  ;;  %v412_v42 = vld [vmem:[#allocation2 + $0x758] sm:$0xff]  ;;  %v958_v44 = vpack.c.bf16 %v395_v38, %v387_v36  ;;  %v896_v45 = vpack.c.bf16 %v410_v40, %v402_v39  ;;  %v401_v46 = vld [vmem:[#allocation2 + $0x700] sm:$0xff]  ;;  %v403_v48 = vld [vmem:[#allocation2 + $0x710] sm:$0xff] }
  0x7e   : > { %v409_v47 = vld [vmem:[#allocation2 + $0x740] sm:$0xff]  ;;  %v960_v49 = vpack.c.bf16 %v412_v42, %v404_v41  ;;  %v411_v50 = vld [vmem:[#allocation2 + $0x750] sm:$0xff]  ;;  %v418_v51 = vld [vmem:[#allocation2 + $0x788] sm:$0xff] }
  0x7f   : > { %879 = vmatpush1.bf16.msra.mxu0 %v878_v58  ;;  %v426_v52 = vld [vmem:[#allocation2 + $0x7c8] sm:$0xff]  ;;  %v420_v53 = vld [vmem:[#allocation2 + $0x798] sm:$0xff]  ;;  %v898_v55 = vpack.c.bf16 %v409_v47, %v401_v46  ;;  %v962_v56 = vpack.c.bf16 %v411_v50, %v403_v48  ;;  %v417_v58 = vld [vmem:[#allocation2 + $0x780] sm:$0xff] }
  0x80   : > { %943 = vmatpush1.bf16.msra.mxu1 %v942_v59  ;;  %881 = vmatprep.subr.bf16.mxu0 %v880_v60  ;;  %v428_v54 = vld [vmem:[#allocation2 + $0x7d8] sm:$0xff]  ;;  %v900_v57 = vpack.c.bf16 %v426_v52, %v418_v51  ;;  %v425_v59 = vld [vmem:[#allocation2 + $0x7c0] sm:$0xff]  ;;  %v419_v60 = vld [vmem:[#allocation2 + $0x790] sm:$0xff] }
  0x81   : > { %945 = vmatprep.subr.bf16.mxu1 %v944_v0  ;;  %v964_v61 = vpack.c.bf16 %v428_v54, %v420_v53  ;;  %v427_v62 = vld [vmem:[#allocation2 + $0x7d0] sm:$0xff]  ;;  %v182_v63 = vld [vmem:[#allocation2 + $0x28] sm:$0xff]  ;;  %v184_v1 = vld [vmem:[#allocation2 + $0x38] sm:$0xff]  ;;  %v902_v3 = vpack.c.bf16 %v425_v59, %v417_v58 }
  0x82   : > { %v190_v0 = vld [vmem:[#allocation2 + $0x68] sm:$0xff]  ;;  %v192_v2 = vld [vmem:[#allocation2 + $0x78] sm:$0xff]  ;;  %v966_v4 = vpack.c.bf16 %v427_v62, %v419_v60  ;;  %v189_v7 = vld [vmem:[#allocation2 + $0x60] sm:$0xff] }
  0x83   : > { %883 = vmatpush1.bf16.msra.mxu0 %v882_v6  ;;  %v968_v5 = vpack.c.bf16 %v190_v0, %v182_v63  ;;  %v181_v6 = vld [vmem:[#allocation2 + $0x20] sm:$0xff]  ;;  %v191_v10 = vld [vmem:[#allocation2 + $0x70] sm:$0xff]  ;;  %v198_v11 = vld [vmem:[#allocation2 + $0xa8] sm:$0xff] }
  0x84   : > { %947 = vmatpush1.bf16.msra.mxu1 %v946_v8  ;;  %885 = vmatprep.subr.bf16.mxu0 %v884_v9  ;;  %v183_v8 = vld [vmem:[#allocation2 + $0x30] sm:$0xff]  ;;  %v1032_v9 = vpack.c.bf16 %v192_v2, %v184_v1  ;;  %v206_v12 = vld [vmem:[#allocation2 + $0xe8] sm:$0xff]  ;;  %v208_v14 = vld [vmem:[#allocation2 + $0xf8] sm:$0xff]  ;;  %v970_v17 = vpack.c.bf16 %v189_v7, %v181_v6 }
  0x85   : > { %949 = vmatprep.subr.bf16.mxu1 %v948_v13  ;;  %v200_v13 = vld [vmem:[#allocation2 + $0xb8] sm:$0xff]  ;;  %v1453_v15 = vld [vmem:[%s1441_s23] sm:$0xff]  ;;  %v1034_v18 = vpack.c.bf16 %v191_v10, %v183_v8  ;;  %v222_v26 = vld [vmem:[#allocation2 + $0x168] sm:$0xff] }
  0x86   : > { %v199_v22 = vld [vmem:[#allocation2 + $0xb0] sm:$0xff]  ;;  %v1036_v23 = vpack.c.bf16 %v208_v14, %v200_v13  ;;  %v216_v27 = vld [vmem:[#allocation2 + $0x138] sm:$0xff]  ;;  %v238_v38 = vld [vmem:[#allocation2 + $0x1e8] sm:$0xff] }
  0x87   : > { %887 = vmatpush1.bf16.msra.mxu0 %v886_v19  ;;  %v972_v19 = vpack.c.bf16 %v206_v12, %v198_v11  ;;  %v207_v24 = vld [vmem:[#allocation2 + $0xf0] sm:$0xff]  ;;  %v224_v28 = vld [vmem:[#allocation2 + $0x178] sm:$0xff]  ;;  %v254_v50 = vld [vmem:[#allocation2 + $0x268] sm:$0xff] }
  0x88   : > { %951 = vmatpush1.bf16.msra.mxu1 %v950_v20  ;;  %889 = vmatprep.subr.bf16.mxu0 %v888_v21  ;;  %v197_v20 = vld [vmem:[#allocation2 + $0xa0] sm:$0xff]  ;;  %v1038_v30 = vpack.c.bf16 %v207_v24, %v199_v22  ;;  %v215_v34 = vld [vmem:[#allocation2 + $0x130] sm:$0xff]  ;;  %v1040_v35 = vpack.c.bf16 %v224_v28, %v216_v27  ;;  %v232_v39 = vld [vmem:[#allocation2 + $0x1b8] sm:$0xff] }
  0x89   : > { %953 = vmatprep.subr.bf16.mxu1 %v952_v25  ;;  %v205_v21 = vld [vmem:[#allocation2 + $0xe0] sm:$0xff]  ;;  %v214_v25 = vld [vmem:[#allocation2 + $0x128] sm:$0xff]  ;;  %v223_v36 = vld [vmem:[#allocation2 + $0x170] sm:$0xff] }
  0x8a   : > { %v974_v29 = vpack.c.bf16 %v205_v21, %v197_v20  ;;  %v240_v40 = vld [vmem:[#allocation2 + $0x1f8] sm:$0xff]  ;;  %v1042_v42 = vpack.c.bf16 %v223_v36, %v215_v34  ;;  %v231_v46 = vld [vmem:[#allocation2 + $0x1b0] sm:$0xff]  ;;  %v262_v60 = vld [vmem:[#allocation2 + $0x2a8] sm:$0xff] }
  0x8b   : > { %891 = vmatpush1.bf16.msra.mxu0 %v890_v31  ;;  %v976_v31 = vpack.c.bf16 %v222_v26, %v214_v25  ;;  %v1044_v47 = vpack.c.bf16 %v240_v40, %v232_v39  ;;  %v239_v48 = vld [vmem:[#allocation2 + $0x1f0] sm:$0xff]  ;;  %v248_v51 = vld [vmem:[#allocation2 + $0x238] sm:$0xff]  ;;  %v278_v8 = vld [vmem:[#allocation2 + $0x328] sm:$0xff] }
  0x8c   : > { %955 = vmatpush1.bf16.msra.mxu1 %v954_v32  ;;  %893 = vmatprep.subr.bf16.mxu0 %v892_v33  ;;  %v213_v32 = vld [vmem:[#allocation2 + $0x120] sm:$0xff]  ;;  %v256_v52 = vld [vmem:[#allocation2 + $0x278] sm:$0xff]  ;;  %v255_v59 = vld [vmem:[#allocation2 + $0x270] sm:$0xff] }
  0x8d   : > { %957 = vmatprep.subr.bf16.mxu1 %v956_v37  ;;  %v221_v33 = vld [vmem:[#allocation2 + $0x160] sm:$0xff]  ;;  %v230_v37 = vld [vmem:[#allocation2 + $0x1a8] sm:$0xff]  ;;  %v1048_v58 = vpack.c.bf16 %v256_v52, %v248_v51  ;;  %v264_v62 = vld [vmem:[#allocation2 + $0x2b8] sm:$0xff] }
  0x8e   : > { %v978_v41 = vpack.c.bf16 %v221_v33, %v213_v32  ;;  %v272_v63 = vld [vmem:[#allocation2 + $0x2f8] sm:$0xff]  ;;  %v271_v7 = vld [vmem:[#allocation2 + $0x2f0] sm:$0xff]  ;;  %v294_v22 = vld [vmem:[#allocation2 + $0x3a8] sm:$0xff] }
  0x8f   : > { %895 = vmatpush1.bf16.msra.mxu0 %v894_v43  ;;  %v980_v43 = vpack.c.bf16 %v238_v38, %v230_v37  ;;  %v1052_v6 = vpack.c.bf16 %v272_v63, %v264_v62  ;;  %v280_v10 = vld [vmem:[#allocation2 + $0x338] sm:$0xff]  ;;  %v287_v21 = vld [vmem:[#allocation2 + $0x370] sm:$0xff]  ;;  %v310_v34 = vld [vmem:[#allocation2 + $0x428] sm:$0xff] }
  0x90   : > { %959 = vmatpush1.bf16.msra.mxu1 %v958_v44  ;;  %897 = vmatprep.subr.bf16.mxu0 %v896_v45  ;;  %v229_v44 = vld [vmem:[#allocation2 + $0x1a0] sm:$0xff]  ;;  %v288_v11 = vld [vmem:[#allocation2 + $0x378] sm:$0xff]  ;;  %v303_v33 = vld [vmem:[#allocation2 + $0x3f0] sm:$0xff] }
  0x91   : > { %961 = vmatprep.subr.bf16.mxu1 %v960_v49  ;;  %v237_v45 = vld [vmem:[#allocation2 + $0x1e0] sm:$0xff]  ;;  %v246_v49 = vld [vmem:[#allocation2 + $0x228] sm:$0xff]  ;;  %v1056_v20 = vpack.c.bf16 %v288_v11, %v280_v10  ;;  %v296_v24 = vld [vmem:[#allocation2 + $0x3b8] sm:$0xff] }
  0x92   : > { %v982_v53 = vpack.c.bf16 %v237_v45, %v229_v44  ;;  %v984_v54 = vpack.c.bf16 %v254_v50, %v246_v49  ;;  %v304_v25 = vld [vmem:[#allocation2 + $0x3f8] sm:$0xff]  ;;  %v319_v45 = vld [vmem:[#allocation2 + $0x470] sm:$0xff] }
  0x93   : > { %899 = vmatpush1.bf16.msra.mxu0 %v898_v55  ;;  %v245_v55 = vld [vmem:[#allocation2 + $0x220] sm:$0xff]  ;;  %v1060_v32 = vpack.c.bf16 %v304_v25, %v296_v24  ;;  %v312_v36 = vld [vmem:[#allocation2 + $0x438] sm:$0xff] }
  0x94   : > { %963 = vmatpush1.bf16.msra.mxu1 %v962_v56  ;;  %901 = vmatprep.subr.bf16.mxu0 %v900_v57  ;;  %v253_v56 = vld [vmem:[#allocation2 + $0x260] sm:$0xff]  ;;  %v247_v57 = vld [vmem:[#allocation2 + $0x230] sm:$0xff]  ;;  %v320_v37 = vld [vmem:[#allocation2 + $0x478] sm:$0xff] }
  0x95   : > { %965 = vmatprep.subr.bf16.mxu1 %v964_v61  ;;  %v270_v61 = vld [vmem:[#allocation2 + $0x2e8] sm:$0xff]  ;;  %v986_v0 = vpack.c.bf16 %v253_v56, %v245_v55  ;;  %v1050_v1 = vpack.c.bf16 %v255_v59, %v247_v57  ;;  %v1064_v44 = vpack.c.bf16 %v320_v37, %v312_v36  ;;  %v336_v49 = vld [vmem:[#allocation2 + $0x4f8] sm:$0xff]  ;;  %v335_v56 = vld [vmem:[#allocation2 + $0x4f0] sm:$0xff] }
  0x96   : > { %v988_v2 = vpack.c.bf16 %v270_v61, %v262_v60  ;;  %v342_v57 = vld [vmem:[#allocation2 + $0x528] sm:$0xff]  ;;  %v344_v59 = vld [vmem:[#allocation2 + $0x538] sm:$0xff] }
  0x97   : > { %903 = vmatpush1.bf16.msra.mxu0 %v902_v3  ;;  %v261_v3 = vld [vmem:[#allocation2 + $0x2a0] sm:$0xff]  ;;  %v352_v60 = vld [vmem:[#allocation2 + $0x578] sm:$0xff] }
  0x98   : > { %967 = vmatpush1.bf16.msra.mxu1 %v966_v4  ;;  %969 = vmatprep.subr.bf16.mxu0 %v968_v5  ;;  %v269_v4 = vld [vmem:[#allocation2 + $0x2e0] sm:$0xff]  ;;  %v263_v5 = vld [vmem:[#allocation2 + $0x2b0] sm:$0xff] }
  0x99   : > { %1033 = vmatprep.subr.bf16.mxu1 %v1032_v9  ;;  %v286_v9 = vld [vmem:[#allocation2 + $0x368] sm:$0xff]  ;;  %v990_v12 = vpack.c.bf16 %v269_v4, %v261_v3  ;;  %v1054_v13 = vpack.c.bf16 %v271_v7, %v263_v5  ;;  %v1072_v3 = vpack.c.bf16 %v352_v60, %v344_v59  ;;  %v351_v4 = vld [vmem:[#allocation2 + $0x570] sm:$0xff]  ;;  %v360_v7 = vld [vmem:[#allocation2 + $0x5b8] sm:$0xff] }
  0x9a   : > { %498 = vmatmul.mubr.f32.vlgmr.msra.gmra.mrb[0].mxu0 %v1453_v15  ;;  %v992_v14 = vpack.c.bf16 %v286_v9, %v278_v8  ;;  %v358_v5 = vld [vmem:[#allocation2 + $0x5a8] sm:$0xff]  ;;  %v368_v8 = vld [vmem:[#allocation2 + $0x5f8] sm:$0xff] }
  0x9b   : > { %569 = vmatmul.mubr.f32.vlgmr.msra.gmra.mrb[0].mxu1 %v1453_v15  ;;  %971 = vmatpush1.bf16.msra.mxu0 %v970_v17  ;;  %v277_v17 = vld [vmem:[#allocation2 + $0x320] sm:$0xff] }
  0x9c   : > { %1035 = vmatpush1.bf16.msra.mxu1 %v1034_v18  ;;  %973 = vmatprep.subr.bf16.mxu0 %v972_v19  ;;  %v285_v18 = vld [vmem:[#allocation2 + $0x360] sm:$0xff]  ;;  %v279_v19 = vld [vmem:[#allocation2 + $0x330] sm:$0xff] }
  0x9d   : > { %1037 = vmatprep.subr.bf16.mxu1 %v1036_v23  ;;  %639 = vmatprep.mubr.f32.mxu0 %v1448_v16  ;;  %v302_v23 = vld [vmem:[#allocation2 + $0x3e8] sm:$0xff]  ;;  %v994_v26 = vpack.c.bf16 %v285_v18, %v277_v17  ;;  %v1058_v27 = vpack.c.bf16 %v287_v21, %v279_v19  ;;  %v1076_v17 = vpack.c.bf16 %v368_v8, %v360_v7  ;;  %v367_v18 = vld [vmem:[#allocation2 + $0x5f0] sm:$0xff]  ;;  %v376_v21 = vld [vmem:[#allocation2 + $0x638] sm:$0xff] }
  0x9e   : > { %710 = vmatprep.mubr.f32.mxu1 %v1448_v16  ;;  %v1046_v16 = vpack.c.bf16 %v239_v48, %v231_v46  ;;  %v996_v28 = vpack.c.bf16 %v302_v23, %v294_v22  ;;  %v326_v46 = vld [vmem:[#allocation2 + $0x4a8] sm:$0xff]  ;;  %v328_v48 = vld [vmem:[#allocation2 + $0x4b8] sm:$0xff] }
  0x9f   : > { %975 = vmatpush1.bf16.msra.mxu0 %v974_v29  ;;  %v293_v29 = vld [vmem:[#allocation2 + $0x3a0] sm:$0xff]  ;;  %v1068_v55 = vpack.c.bf16 %v336_v49, %v328_v48  ;;  %v374_v19 = vld [vmem:[#allocation2 + $0x628] sm:$0xff]  ;;  %v384_v22 = vld [vmem:[#allocation2 + $0x678] sm:$0xff] }
  0xa0   : > { %1039 = vmatpush1.bf16.msra.mxu1 %v1038_v30  ;;  %977 = vmatprep.subr.bf16.mxu0 %v976_v31  ;;  %v301_v30 = vld [vmem:[#allocation2 + $0x3e0] sm:$0xff]  ;;  %v295_v31 = vld [vmem:[#allocation2 + $0x3b0] sm:$0xff] }
  0xa1   : > { %1041 = vmatprep.subr.bf16.mxu1 %v1040_v35  ;;  %v318_v35 = vld [vmem:[#allocation2 + $0x468] sm:$0xff]  ;;  %v998_v38 = vpack.c.bf16 %v301_v30, %v293_v29  ;;  %v1062_v39 = vpack.c.bf16 %v303_v33, %v295_v31  ;;  %v1080_v29 = vpack.c.bf16 %v384_v22, %v376_v21  ;;  %v383_v30 = vld [vmem:[#allocation2 + $0x670] sm:$0xff]  ;;  %v392_v33 = vld [vmem:[#allocation2 + $0x6b8] sm:$0xff] }
  0xa2   : > { %v1000_v40 = vpack.c.bf16 %v318_v35, %v310_v34  ;;  %v390_v31 = vld [vmem:[#allocation2 + $0x6a8] sm:$0xff]  ;;  %v400_v34 = vld [vmem:[#allocation2 + $0x6f8] sm:$0xff] }
  0xa3   : > { %979 = vmatpush1.bf16.msra.mxu0 %v978_v41  ;;  %v309_v41 = vld [vmem:[#allocation2 + $0x420] sm:$0xff] }
  0xa4   : > { %1043 = vmatpush1.bf16.msra.mxu1 %v1042_v42  ;;  %981 = vmatprep.subr.bf16.mxu0 %v980_v43  ;;  %v317_v42 = vld [vmem:[#allocation2 + $0x460] sm:$0xff]  ;;  %v311_v43 = vld [vmem:[#allocation2 + $0x430] sm:$0xff] }
  0xa5   : > { %1045 = vmatprep.subr.bf16.mxu1 %v1044_v47  ;;  %v334_v47 = vld [vmem:[#allocation2 + $0x4e8] sm:$0xff]  ;;  %v1002_v50 = vpack.c.bf16 %v317_v42, %v309_v41  ;;  %v1066_v51 = vpack.c.bf16 %v319_v45, %v311_v43  ;;  %v1084_v41 = vpack.c.bf16 %v400_v34, %v392_v33  ;;  %v399_v42 = vld [vmem:[#allocation2 + $0x6f0] sm:$0xff]  ;;  %v408_v45 = vld [vmem:[#allocation2 + $0x738] sm:$0xff] }
  0xa6   : > { %v1004_v52 = vpack.c.bf16 %v334_v47, %v326_v46  ;;  %v406_v43 = vld [vmem:[#allocation2 + $0x728] sm:$0xff]  ;;  %v416_v46 = vld [vmem:[#allocation2 + $0x778] sm:$0xff] }
  0xa7   : > { %983 = vmatpush1.bf16.msra.mxu0 %v982_v53  ;;  %v325_v53 = vld [vmem:[#allocation2 + $0x4a0] sm:$0xff] }
  0xa8   : > { %1047 = vmatpush1.bf16.msra.mxu1 %v1046_v16  ;;  %985 = vmatprep.subr.bf16.mxu0 %v984_v54  ;;  %v333_v16 = vld [vmem:[#allocation2 + $0x4e0] sm:$0xff]  ;;  %v327_v54 = vld [vmem:[#allocation2 + $0x4b0] sm:$0xff] }
  0xa9   : > { %1049 = vmatprep.subr.bf16.mxu1 %v1048_v58  ;;  %v350_v58 = vld [vmem:[#allocation2 + $0x568] sm:$0xff]  ;;  %v1006_v61 = vpack.c.bf16 %v333_v16, %v325_v53  ;;  %v1070_v62 = vpack.c.bf16 %v335_v56, %v327_v54  ;;  %v1088_v53 = vpack.c.bf16 %v416_v46, %v408_v45  ;;  %v415_v16 = vld [vmem:[#allocation2 + $0x770] sm:$0xff]  ;;  %v424_v56 = vld [vmem:[#allocation2 + $0x7b8] sm:$0xff] }
  0xaa   : > { %v1008_v63 = vpack.c.bf16 %v350_v58, %v342_v57  ;;  %v422_v54 = vld [vmem:[#allocation2 + $0x7a8] sm:$0xff]  ;;  %v432_v57 = vld [vmem:[#allocation2 + $0x7f8] sm:$0xff] }
  0xab   : > { %987 = vmatpush1.bf16.msra.mxu0 %v986_v0  ;;  %v341_v0 = vld [vmem:[#allocation2 + $0x520] sm:$0xff] }
  0xac   : > { %1051 = vmatpush1.bf16.msra.mxu1 %v1050_v1  ;;  %989 = vmatprep.subr.bf16.mxu0 %v988_v2  ;;  %v349_v1 = vld [vmem:[#allocation2 + $0x560] sm:$0xff]  ;;  %v343_v2 = vld [vmem:[#allocation2 + $0x530] sm:$0xff] }
  0xad   : > { %1053 = vmatprep.subr.bf16.mxu1 %v1052_v6  ;;  %v366_v6 = vld [vmem:[#allocation2 + $0x5e8] sm:$0xff]  ;;  %v1010_v9 = vpack.c.bf16 %v349_v1, %v341_v0  ;;  %v1074_v10 = vpack.c.bf16 %v351_v4, %v343_v2  ;;  %v423_v0 = vld [vmem:[#allocation2 + $0x7b0] sm:$0xff] }
  0xae   : > { %v1012_v11 = vpack.c.bf16 %v366_v6, %v358_v5  ;;  %v431_v1 = vld [vmem:[#allocation2 + $0x7f0] sm:$0xff] }
  0xaf   : > { %991 = vmatpush1.bf16.msra.mxu0 %v990_v12  ;;  %v357_v12 = vld [vmem:[#allocation2 + $0x5a0] sm:$0xff] }
  0xb0   : > { %1055 = vmatpush1.bf16.msra.mxu1 %v1054_v13  ;;  %993 = vmatprep.subr.bf16.mxu0 %v992_v14  ;;  %v365_v13 = vld [vmem:[#allocation2 + $0x5e0] sm:$0xff]  ;;  %v359_v14 = vld [vmem:[#allocation2 + $0x5b0] sm:$0xff] }
  0xb1   : > { %1057 = vmatprep.subr.bf16.mxu1 %v1056_v20  ;;  %v382_v20 = vld [vmem:[#allocation2 + $0x668] sm:$0xff]  ;;  %v1014_v23 = vpack.c.bf16 %v365_v13, %v357_v12  ;;  %v1078_v24 = vpack.c.bf16 %v367_v18, %v359_v14 }
  0xb2   : > { %v1016_v25 = vpack.c.bf16 %v382_v20, %v374_v19 }
  0xb3   : > { %995 = vmatpush1.bf16.msra.mxu0 %v994_v26  ;;  %v373_v26 = vld [vmem:[#allocation2 + $0x620] sm:$0xff] }
  0xb4   : > { %1059 = vmatpush1.bf16.msra.mxu1 %v1058_v27  ;;  %997 = vmatprep.subr.bf16.mxu0 %v996_v28  ;;  %v381_v27 = vld [vmem:[#allocation2 + $0x660] sm:$0xff]  ;;  %v375_v28 = vld [vmem:[#allocation2 + $0x630] sm:$0xff] }
  0xb5   : > { %1061 = vmatprep.subr.bf16.mxu1 %v1060_v32  ;;  %v398_v32 = vld [vmem:[#allocation2 + $0x6e8] sm:$0xff]  ;;  %v1018_v35 = vpack.c.bf16 %v381_v27, %v373_v26  ;;  %v1082_v36 = vpack.c.bf16 %v383_v30, %v375_v28 }
  0xb6   : > { %v1020_v37 = vpack.c.bf16 %v398_v32, %v390_v31 }
  0xb7   : > { %999 = vmatpush1.bf16.msra.mxu0 %v998_v38  ;;  %v389_v38 = vld [vmem:[#allocation2 + $0x6a0] sm:$0xff] }
  0xb8   : > { %1063 = vmatpush1.bf16.msra.mxu1 %v1062_v39  ;;  %1001 = vmatprep.subr.bf16.mxu0 %v1000_v40  ;;  %v397_v39 = vld [vmem:[#allocation2 + $0x6e0] sm:$0xff]  ;;  %v391_v40 = vld [vmem:[#allocation2 + $0x6b0] sm:$0xff] }
  0xb9   : > { %1065 = vmatprep.subr.bf16.mxu1 %v1064_v44  ;;  %v414_v44 = vld [vmem:[#allocation2 + $0x768] sm:$0xff]  ;;  %v1022_v47 = vpack.c.bf16 %v397_v39, %v389_v38  ;;  %v1086_v48 = vpack.c.bf16 %v399_v42, %v391_v40 }
  0xba   : > { %v1024_v49 = vpack.c.bf16 %v414_v44, %v406_v43 }
  0xbb   : > { %1003 = vmatpush1.bf16.msra.mxu0 %v1002_v50  ;;  %v405_v50 = vld [vmem:[#allocation2 + $0x720] sm:$0xff] }
  0xbc   : > { %1067 = vmatpush1.bf16.msra.mxu1 %v1066_v51  ;;  %1005 = vmatprep.subr.bf16.mxu0 %v1004_v52  ;;  %v413_v51 = vld [vmem:[#allocation2 + $0x760] sm:$0xff]  ;;  %v407_v52 = vld [vmem:[#allocation2 + $0x730] sm:$0xff] }
  0xbd   : > { %1069 = vmatprep.subr.bf16.mxu1 %v1068_v55  ;;  %v430_v55 = vld [vmem:[#allocation2 + $0x7e8] sm:$0xff]  ;;  %v1026_v58 = vpack.c.bf16 %v413_v51, %v405_v50  ;;  %v1090_v59 = vpack.c.bf16 %v415_v16, %v407_v52 }
  0xbe   : > { %v1028_v60 = vpack.c.bf16 %v430_v55, %v422_v54 }
  0xbf   : > { %1007 = vmatpush1.bf16.msra.mxu0 %v1006_v61  ;;  %v421_v61 = vld [vmem:[#allocation2 + $0x7a0] sm:$0xff] }
  0xc0   : > { %1071 = vmatpush1.bf16.msra.mxu1 %v1070_v62  ;;  %1009 = vmatprep.subr.bf16.mxu0 %v1008_v63  ;;  %v429_v62 = vld [vmem:[#allocation2 + $0x7e0] sm:$0xff]  ;;  %v1092_v63 = vpack.c.bf16 %v432_v57, %v424_v56 }
  0xc1   : > { %1073 = vmatprep.subr.bf16.mxu1 %v1072_v3  ;;  %v1030_v2 = vpack.c.bf16 %v429_v62, %v421_v61  ;;  %v1094_v3 = vpack.c.bf16 %v431_v1, %v423_v0 }
  0xc3   : > { %1011 = vmatpush1.bf16.msra.mxu0 %v1010_v9 }
  0xc4   : > { %1075 = vmatpush1.bf16.msra.mxu1 %v1074_v10  ;;  %1013 = vmatprep.subr.bf16.mxu0 %v1012_v11 }
  0xc5   : > { %1077 = vmatprep.subr.bf16.mxu1 %v1076_v17 }
  0xc7   : > { %1015 = vmatpush1.bf16.msra.mxu0 %v1014_v23 }
  0xc8   : > { %1079 = vmatpush1.bf16.msra.mxu1 %v1078_v24  ;;  %1017 = vmatprep.subr.bf16.mxu0 %v1016_v25 }
  0xc9   : > { %1081 = vmatprep.subr.bf16.mxu1 %v1080_v29 }
  0xcb   : > { %1019 = vmatpush1.bf16.msra.mxu0 %v1018_v35 }
  0xcc   : > { %1083 = vmatpush1.bf16.msra.mxu1 %v1082_v36  ;;  %1021 = vmatprep.subr.bf16.mxu0 %v1020_v37 }
  0xcd   : > { %1085 = vmatprep.subr.bf16.mxu1 %v1084_v41 }
  0xcf   : > { %1023 = vmatpush1.bf16.msra.mxu0 %v1022_v47 }
  0xd0   : > { %1087 = vmatpush1.bf16.msra.mxu1 %v1086_v48  ;;  %1025 = vmatprep.subr.bf16.mxu0 %v1024_v49 }
  0xd1   : > { %1089 = vmatprep.subr.bf16.mxu1 %v1088_v53 }
  0xd3   : > { %1027 = vmatpush1.bf16.msra.mxu0 %v1026_v58 }
  0xd4   : > { %1091 = vmatpush1.bf16.msra.mxu1 %v1090_v59  ;;  %1029 = vmatprep.subr.bf16.mxu0 %v1028_v60 }
  0xd5   : > { %1093 = vmatprep.subr.bf16.mxu1 %v1092_v63 }
  0xd7   : > { %1031 = vmatpush1.bf16.msra.mxu0 %v1030_v2 }
  0xd8   : > { %1095 = vmatpush1.bf16.msra.mxu1 %v1094_v3 }
  0xda   : > { %640 = vmatmul.mubr.f32.vlgmr.msra.gmra.mrb[2].mxu0 %v1453_v15 }
  0xdb   : > { %711 = vmatmul.mubr.f32.vlgmr.msra.gmra.mrb[2].mxu1 %v1453_v15 }
 0x16d   : > { %v499_v4 = vpop.f32.mrb[0].mxu0 }
 0x16e   : > { %717 = vst [vmem:[%s174_s17] sm:$0xff] %v499_v4  ;;  %v570_v5 = vpop.f32.mrb[0].mxu1  ;;  %v501_v6 = vpop.f32.mrb[1].mxu0 }
 0x16f   : > { %719 = vst [vmem:[%s174_s17 + $0x10] sm:$0xff] %v570_v5  ;;  %718 = vst [vmem:[%s174_s17 + $0x8] sm:$0xff] %v501_v6  ;;  %v572_v7 = vpop.f32.mrb[1].mxu1 }
 0x170   : > { %720 = vst [vmem:[%s174_s17 + $0x18] sm:$0xff] %v572_v7 }
 0x1ad   : > { %v641_v8 = vpop.f32.mrb[2].mxu0 }
 0x1ae   : > { %721 = vst [vmem:[%s174_s17 + $0x20] sm:$0xff] %v641_v8  ;;  %v712_v9 = vpop.f32.mrb[2].mxu1  ;;  %v643_v10 = vpop.f32.mrb[3].mxu0 }
 0x1af   : > { %723 = vst [vmem:[%s174_s17 + $0x30] sm:$0xff] %v712_v9  ;;  %722 = vst [vmem:[%s174_s17 + $0x28] sm:$0xff] %v643_v10  ;;  %v714_v15 = vpop.f32.mrb[3].mxu1 }
 0x1b0   : > { %724 = vst [vmem:[%s174_s17 + $0x38] sm:$0xff] %v714_v15 }
 0x1b1   : > { %1226 = shalt.err (!%p1223_p7)
}
 0x1b2   : > { %s1227_s7 = scalar_lea.hbm %s1466_s30, 1024  ;;  %s1231_s25 = scalar_lea.hbm %s1511_s2, 3072 }
 0x1b3   : > { %p1228_p9 = scmp.ne.s32.totalorder %s1466_s30, %s1227_s7  ;;  %p1232_p0 = scmp.lt.u32.totalorder %s1466_s30, %s1511_s2 }
 0x1b4   : > { %p1233_p2 = scmp.lt.u32.totalorder %s1231_s25, %s1227_s7  ;;  %p1235_p1 = scmp.lt.u32.totalorder %s1227_s7, %s1466_s30 }
 0x1b5   : > { %p1229_p11 = pnand %p1228_p9, %p1388_p12 }
 0x1b6   : > { %p1234_p10 = por %p1233_p2, %p1232_p0 }
 0x1b7   : > { %p1230_p5 = pneg %p1229_p11 }
 0x1b8   : > { %p1236_p4 = por %p1235_p1, %p1234_p10 }
 0x1ba   : > { %p1237_p6 = pnand %p1236_p4, %p1230_p5 }
 0x1bc   : > { %1240 = shalt.err (!%p1237_p6)
}
 0x1bd   : > { %1102 = dma.vmem_to_hbm [thread:$0]  (%p1388_p12), %s1468_s22, 1024, %s1466_s30, %s726_s13  }
 0x1be PF: > { %p1119_p8 = scmp.ge.s32.totalorder %s1283_s12, 2  ;;  %s752_s19 = sand.u32 1, %s1271_s9  }
 0x1bf   : > { %p1526_p13 = scmp.ne.s32.totalorder %s1516_s16, 0  ;;  %s753_s23 = scalar_lea.sflag [#allocation4], %s752_s19 }
 0x1c1   : > { %p1113_p3 = pnand %p1119_p8, %p1526_p13 }
 0x1c3   : > { %1266 = dma.done.wait (!%p1113_p3), %s753_s23, 1024  }
 0x1c4   : > { %1268 = vsyncadd (!%p1113_p3), %s753_s23, 4294966272  ;;  %p16_p7 = scmp.ge.s32.totalorder %s1358_s21, 5   ;;  %s1527_s9 = smov %s1275_s10 }
 0x1c5   : > { %s1528_s10 = smov %s1279_s11  ;;  %s1529_s11 = smov %s1384_s8 }
 0x1c6   : > { %s1530_s12 = smov %s1358_s21  ;;  %18 = sbr.rel (!%p16_p7) target bundleno = 6 (0x6), region = 78 }
 0x1cd   :  { %758 = vsyncpa [#allocation3], 1 }
 0x1ce   :  { %760 = vsyncpa [#allocation3 + $0x1], 1 }
 0x1cf   :  { %761 = vsyncpa [#allocation6], 1 }
 0x1d0   :  { %763 = vsyncpa [#allocation6 + $0x1], 1 }
 0x1d1   :  { %764 = vsyncpa [#allocation4], 1 }
 0x1d2   :  { %766 = vsyncpa [#allocation4 + $0x1], 1 }

</bundles_post_ra>
